<compile_context>
chip_gen: v6e
topology: v6e:2x2x1
jax: 0.10.0
libtpu: 0.0.40
codegen_flags: <defaults>
</compile_context>

<pallas_src>
import functools

import jax
import jax.numpy as jnp
from jax.experimental import pallas as pl
from jax.experimental.pallas import tpu as pltpu


def _combined_loss_kernel(pred_ref, tgt_ref, alpha_ref, out_ref, acc_ref, *,
                          ce_weight, focal_weight, smooth_weight,
                          gamma, smoothing, num_classes, n_valid):
    s = pl.program_id(0)          # split (parallel)
    j = pl.program_id(1)          # block within split (arbitrary / accumulate)

    @pl.when(j == 0)
    def _init():
        acc_ref[...] = jnp.zeros_like(acc_ref)

    pred = pred_ref[...].astype(jnp.float32)        # (C, BN)
    tgt = tgt_ref[...]                              # (1, BN) int32
    alpha = alpha_ref[...].astype(jnp.float32)      # (C, 1)

    c, bn = pred.shape

    # One-hot: class index on the sublane axis vs. lane-dense targets.
    class_iota = jax.lax.broadcasted_iota(jnp.int32, (c, bn), 0)
    onehot = (class_iota == tgt).astype(jnp.float32)            # (C, BN)

    # Numerically-stable log-softmax pieces along the class (sublane) axis.
    m = jnp.max(pred, axis=0, keepdims=True)                    # (1, BN)
    shifted = pred - m
    lse = jnp.log(jnp.sum(jnp.exp(shifted), axis=0, keepdims=True))

    # Single one-hot gather, reused for CE and alpha_t.
    pred_t = jnp.sum(onehot * shifted, axis=0, keepdims=True)   # logit[target]-m
    ce_i = lse - pred_t                                         # -log p[target]
    alpha_t = jnp.sum(onehot * alpha, axis=0, keepdims=True)    # (1, BN)

    # Enhanced focal loss; gamma == 2 avoids pow -> exp(gamma*log(x)).
    pt = jnp.exp(-ce_i)
    omp = jnp.maximum(1.0 - pt, 0.0)
    if float(gamma) == 2.0:
        fac = omp * omp
    else:
        fac = omp ** gamma
    focal_i = alpha_t * fac * ce_i

    # Fused label-smoothing CE: true_dist = base + (1 - smoothing - base)*onehot
    #   => smooth_i = -base*sum(logp) + (1 - smoothing - base)*ce_i
    # with sum(logp) = sum(shifted) - C*lse (reuses existing reductions).
    base = smoothing / (num_classes - 1)
    sum_logp = jnp.sum(shifted, axis=0, keepdims=True) - c * lse
    smooth_i = -base * sum_logp + (1.0 - smoothing - base) * ce_i

    # Mask padded batch columns.
    col0 = (s * pl.num_programs(1) + j) * bn
    col = col0 + jax.lax.broadcasted_iota(jnp.int32, (1, bn), 1)
    mask = (col < n_valid).astype(jnp.float32)

    contrib = (ce_weight * ce_i + focal_weight * focal_i
               + smooth_weight * smooth_i) * mask               # (1, BN)
    acc_ref[...] += jnp.sum(contrib, axis=(0, 1), keepdims=True)

    @pl.when(j == pl.num_programs(1) - 1)
    def _finalize():
        out_ref[0, 0] = acc_ref[0, 0] * (1.0 / n_valid)


def combined_classification_loss(pred, target, alpha,
                                 ce_weight=0.4, focal_weight=0.4,
                                 smooth_weight=0.2, gamma=2.0,
                                 smoothing=0.1, num_classes=5,
                                 block_n=2048):
    n, c = pred.shape

    # Lane-granular (multiple of 128) block over the batch axis, capped at
    # what is needed to cover n in a single block.
    block_n = max(128, 128 * (block_n // 128))
    block_n = min(block_n, 128 * pl.cdiv(n, 128))
    num_blocks = pl.cdiv(n, block_n)
    n_splits = 2 if num_blocks >= 2 else 1       # 2 partials -> dual TC on v7x
    bps = pl.cdiv(num_blocks, n_splits)          # blocks per split
    padded_n = n_splits * bps * block_n

    # (C, N) layout: class on sublanes, batch lane-dense.  bf16 pred accepted
    # as-is (halves HBM bytes); the kernel upcasts after load.
    pred_cn = jnp.pad(pred.T, ((0, 0), (0, padded_n - n)))
    tgt2d = jnp.pad(target.astype(jnp.int32).reshape(1, n),
                    ((0, 0), (0, padded_n - n)))
    alpha2d = alpha.astype(jnp.float32).reshape(c, 1)

    kernel = functools.partial(
        _combined_loss_kernel,
        ce_weight=float(ce_weight), focal_weight=float(focal_weight),
        smooth_weight=float(smooth_weight), gamma=float(gamma),
        smoothing=float(smoothing), num_classes=int(num_classes),
        n_valid=int(n))

    cost = pl.CostEstimate(
        flops=14 * n * c + 24 * n,
        transcendentals=n * c + 3 * n,
        bytes_accessed=n * c * pred.dtype.itemsize + n * 4 + c * 4 + 8)

    partials = pl.pallas_call(
        kernel,
        out_shape=jax.ShapeDtypeStruct((n_splits, 1), jnp.float32),
        grid_spec=pltpu.PrefetchScalarGridSpec(
            num_scalar_prefetch=0,
            grid=(n_splits, bps),
            in_specs=[
                # pred (C, N): tile the lane-dense batch axis only.
                pl.BlockSpec((c, block_n), lambda s, j: (0, s * bps + j)),
                # target (1, N) int32, lane-dense.
                pl.BlockSpec((1, block_n), lambda s, j: (0, s * bps + j)),
                # alpha (C, 1): constant index_map -> resident, DMA'd once.
                pl.BlockSpec((c, 1), lambda s, j: (0, 0)),
            ],
            out_specs=pl.BlockSpec((1, 1), lambda s, j: (s, 0),
                                   memory_space=pltpu.SMEM),
            scratch_shapes=[pltpu.VMEM((1, 1), jnp.float32)],
        ),
        compiler_params=pltpu.CompilerParams(
            dimension_semantics=("parallel", "arbitrary")),
        cost_estimate=cost,
    )(pred_cn, tgt2d, alpha2d)

    # Each split already divided by n, so the total mean is the sum of partials.
    return jnp.sum(partials)


def _reference_loss(pred, target, alpha, ce_weight=0.4, focal_weight=0.4,
                    smooth_weight=0.2, gamma=2.0, smoothing=0.1,
                    num_classes=5):
    logp = jax.nn.log_softmax(pred.astype(jnp.float32), axis=1)
    ce_i = -jnp.take_along_axis(logp, target[:, None], axis=1)[:, 0]
    ce = ce_i.mean()
    pt = jnp.exp(-ce_i)
    focal = (alpha[target] * (1.0 - pt) ** gamma * ce_i).mean()
    onehot = jax.nn.one_hot(target, pred.shape[1])
    base = smoothing / (num_classes - 1)
    true_dist = base * (1.0 - onehot) + (1.0 - smoothing) * onehot
    smooth = jnp.sum(-true_dist * logp, axis=1).mean()
    return ce_weight * ce + focal_weight * focal + smooth_weight * smooth


if __name__ == "__main__":
    num_classes = 5

    key = jax.random.PRNGKey(0)
    k1, k2, k3, k4 = jax.random.split(key, 4)

    # Case 1: small batch (single block, padded/masked lanes).
    n1 = 8
    pred1 = jax.random.normal(k1, (n1, num_classes), dtype=jnp.float32)
    tgt1 = jax.random.randint(k2, (n1,), 0, num_classes, dtype=jnp.int32)
    alpha = jnp.ones((num_classes,), dtype=jnp.float32)  # EnhancedFocalLoss default

    loss1 = combined_classification_loss(pred1, tgt1, alpha,
                                         num_classes=num_classes)
    jax.block_until_ready(loss1)
    ref1 = _reference_loss(pred1, tgt1, alpha, num_classes=num_classes)
    assert jnp.allclose(loss1, ref1, atol=1e-5, rtol=1e-5), (loss1, ref1)

    # Case 2: exercises the (parallel split, arbitrary accumulate) grid and
    # the batch-padding mask with a small 128-lane block.
    n2 = 300
    pred2 = jax.random.normal(k3, (n2, num_classes), dtype=jnp.float32)
    tgt2 = jax.random.randint(k4, (n2,), 0, num_classes, dtype=jnp.int32)
    loss2 = combined_classification_loss(pred2, tgt2, alpha,
                                         num_classes=num_classes, block_n=128)
    jax.block_until_ready(loss2)
    ref2 = _reference_loss(pred2, tgt2, alpha, num_classes=num_classes)
    assert jnp.allclose(loss2, ref2, atol=1e-5, rtol=1e-5), (loss2, ref2)

    print("KERNEL_OK")
</pallas_src>

<mosaic_0001>
module attributes {stable_mosaic.version = 11 : i64} {
  func.func @_combined_loss_kernel(%arg0: i32, %arg1: i32, %arg2: memref<5x128xf32, #tpu.memory_space<vmem>>, %arg3: memref<1x128xi32, #tpu.memory_space<vmem>>, %arg4: memref<5x1xf32, #tpu.memory_space<vmem>>, %arg5: memref<1x1xf32, #tpu.memory_space<smem>>, %arg6: memref<1x1xf32, #tpu.memory_space<vmem>>) attributes {dimension_semantics = [#tpu.dimension_semantics<parallel>, #tpu.dimension_semantics<arbitrary>], iteration_bounds = array<i64: 1, 1>, scalar_prefetch = 0 : i64, scratch_operands = 1 : i64, tpu.core_type = #tpu.core_type<tc>, window_params = [{transform_indices = @transform_0, window_bounds = array<i64: 5, 128>}, {transform_indices = @transform_1, window_bounds = array<i64: 1, 128>}, {pipeline_mode = #tpu.pipeline_mode<synchronous>, transform_indices = @transform_2, window_bounds = array<i64: 5, 1>}, {transform_indices = @transform_3, window_bounds = array<i64: 1, 1>}]} {
    %c0_i32 = arith.constant 0 : i32
    %0 = arith.cmpi eq, %arg1, %c0_i32 : i32
    %1 = arith.extui %0 : i1 to i32
    %c0_i32_0 = arith.constant 0 : i32
    %2 = arith.cmpi ne, %1, %c0_i32_0 : i32
    scf.if %2 {
      %cst_26 = arith.constant 0.000000e+00 : f32
      %77 = vector.broadcast %cst_26 : f32 to vector<1x1xf32>
      %c0_27 = arith.constant 0 : index
      %c0_28 = arith.constant 0 : index
      %78 = vector.load %arg6[%c0_27, %c0_28] : memref<1x1xf32, #tpu.memory_space<vmem>>, vector<1x1xf32>
      tpu.vector_store %arg6[%c0_27, %c0_28], %77 {strides = array<i32>} : memref<1x1xf32, #tpu.memory_space<vmem>>, vector<1x1xf32>,
    } else {
    }
    %c0 = arith.constant 0 : index
    %c0_1 = arith.constant 0 : index
    %3 = vector.load %arg2[%c0, %c0_1] : memref<5x128xf32, #tpu.memory_space<vmem>>, vector<5x128xf32>
    %c0_2 = arith.constant 0 : index
    %c0_3 = arith.constant 0 : index
    %4 = vector.load %arg3[%c0_2, %c0_3] : memref<1x128xi32, #tpu.memory_space<vmem>>, vector<1x128xi32>
    %c0_4 = arith.constant 0 : index
    %c0_5 = arith.constant 0 : index
    %5 = vector.load %arg4[%c0_4, %c0_5] : memref<5x1xf32, #tpu.memory_space<vmem>>, vector<5x1xf32>
    %6 = tpu.iota {dimensions = array<i32: 0>} : vector<5x128xi32>
    %7 = vector.broadcast %4 : vector<1x128xi32> to vector<5x128xi32>
    %8 = arith.cmpi eq, %6, %7 : vector<5x128xi32>
    %9 = arith.extui %8 : vector<5x128xi1> to vector<5x128xi32>
    %10 = arith.sitofp %9 : vector<5x128xi32> to vector<5x128xf32>
    %cst = arith.constant dense<0xFF800000> : vector<128xf32>
    %11 = vector.multi_reduction <maximumf>, %3, %cst [0] : vector<5x128xf32> to vector<128xf32>
    %12 = vector.shape_cast %11 : vector<128xf32> to vector<1x128xf32>
    %13 = vector.broadcast %12 : vector<1x128xf32> to vector<5x128xf32>
    %14 = arith.subf %3, %13 : vector<5x128xf32>
    %15 = math.exp %14 : vector<5x128xf32>
    %cst_6 = arith.constant dense<0.000000e+00> : vector<128xf32>
    %16 = vector.multi_reduction <add>, %15, %cst_6 [0] : vector<5x128xf32> to vector<128xf32>
    %17 = vector.shape_cast %16 : vector<128xf32> to vector<1x128xf32>
    %18 = math.log %17 : vector<1x128xf32>
    %19 = arith.mulf %10, %14 : vector<5x128xf32>
    %cst_7 = arith.constant dense<0.000000e+00> : vector<128xf32>
    %20 = vector.multi_reduction <add>, %19, %cst_7 [0] : vector<5x128xf32> to vector<128xf32>
    %21 = vector.shape_cast %20 : vector<128xf32> to vector<1x128xf32>
    %22 = arith.subf %18, %21 : vector<1x128xf32>
    %23 = vector.broadcast %5 : vector<5x1xf32> to vector<5x128xf32>
    %24 = arith.mulf %10, %23 : vector<5x128xf32>
    %cst_8 = arith.constant dense<0.000000e+00> : vector<128xf32>
    %25 = vector.multi_reduction <add>, %24, %cst_8 [0] : vector<5x128xf32> to vector<128xf32>
    %26 = vector.shape_cast %25 : vector<128xf32> to vector<1x128xf32>
    %cst_9 = arith.constant 0.000000e+00 : f32
    %27 = vector.broadcast %cst_9 : f32 to vector<1x128xf32>
    %28 = arith.subf %27, %22 : vector<1x128xf32>
    %29 = math.exp %28 : vector<1x128xf32>
    %cst_10 = arith.constant 1.000000e+00 : f32
    %30 = vector.broadcast %cst_10 : f32 to vector<1x128xf32>
    %31 = arith.subf %30, %29 : vector<1x128xf32>
    %cst_11 = arith.constant 0.000000e+00 : f32
    %32 = vector.broadcast %cst_11 : f32 to vector<1x128xf32>
    %33 = arith.maximumf %31, %32 : vector<1x128xf32>
    %34 = arith.mulf %33, %33 : vector<1x128xf32>
    %35 = arith.mulf %26, %34 : vector<1x128xf32>
    %36 = arith.mulf %35, %22 : vector<1x128xf32>
    %cst_12 = arith.constant dense<0.000000e+00> : vector<128xf32>
    %37 = vector.multi_reduction <add>, %14, %cst_12 [0] : vector<5x128xf32> to vector<128xf32>
    %38 = vector.shape_cast %37 : vector<128xf32> to vector<1x128xf32>
    %cst_13 = arith.constant 5.000000e+00 : f32
    %39 = vector.broadcast %cst_13 : f32 to vector<1x128xf32>
    %40 = arith.mulf %39, %18 : vector<1x128xf32>
    %41 = arith.subf %38, %40 : vector<1x128xf32>
    %cst_14 = arith.constant -2.500000e-02 : f32
    %42 = vector.broadcast %cst_14 : f32 to vector<1x128xf32>
    %43 = arith.mulf %42, %41 : vector<1x128xf32>
    %cst_15 = arith.constant 8.750000e-01 : f32
    %44 = vector.broadcast %cst_15 : f32 to vector<1x128xf32>
    %45 = arith.mulf %44, %22 : vector<1x128xf32>
    %46 = arith.addf %43, %45 : vector<1x128xf32>
    %c1_i32 = arith.constant 1 : i32
    %47 = arith.muli %arg0, %c1_i32 : i32
    %48 = arith.addi %47, %arg1 : i32
    %c128_i32 = arith.constant 128 : i32
    %49 = arith.muli %48, %c128_i32 : i32
    %50 = tpu.iota {dimensions = array<i32: 1>} : vector<1x128xi32>
    %51 = vector.broadcast %49 : i32 to vector<1x128xi32>
    %52 = arith.addi %51, %50 : vector<1x128xi32>
    %c8_i32 = arith.constant 8 : i32
    %53 = vector.broadcast %c8_i32 : i32 to vector<1x128xi32>
    %54 = arith.cmpi slt, %52, %53 : vector<1x128xi32>
    %55 = arith.extui %54 : vector<1x128xi1> to vector<1x128xi32>
    %56 = arith.sitofp %55 : vector<1x128xi32> to vector<1x128xf32>
    %cst_16 = arith.constant 4.000000e-01 : f32
    %57 = vector.broadcast %cst_16 : f32 to vector<1x128xf32>
    %58 = arith.mulf %57, %22 : vector<1x128xf32>
    %cst_17 = arith.constant 4.000000e-01 : f32
    %59 = vector.broadcast %cst_17 : f32 to vector<1x128xf32>
    %60 = arith.mulf %59, %36 : vector<1x128xf32>
    %61 = arith.addf %58, %60 : vector<1x128xf32>
    %cst_18 = arith.constant 2.000000e-01 : f32
    %62 = vector.broadcast %cst_18 : f32 to vector<1x128xf32>
    %63 = arith.mulf %62, %46 : vector<1x128xf32>
    %64 = arith.addf %61, %63 : vector<1x128xf32>
    %65 = arith.mulf %64, %56 : vector<1x128xf32>
    %c0_19 = arith.constant 0 : index
    %c0_20 = arith.constant 0 : index
    %66 = vector.load %arg6[%c0_19, %c0_20] : memref<1x1xf32, #tpu.memory_space<vmem>>, vector<1x1xf32>
    %67 = vector.shape_cast %65 : vector<1x128xf32> to vector<1x1x128xf32>
    %cst_21 = arith.constant dense<0.000000e+00> : vector<1xf32>
    %68 = vector.multi_reduction <add>, %67, %cst_21 [1, 2] : vector<1x1x128xf32> to vector<1xf32>
    %69 = vector.shape_cast %68 : vector<1xf32> to vector<1x1x1xf32>
    %70 = vector.extract %69[0, 0, 0] : f32 from vector<1x1x1xf32>
    %71 = vector.broadcast %70 : f32 to vector<1x1xf32>
    %72 = arith.addf %66, %71 : vector<1x1xf32>
    %c0_22 = arith.constant 0 : index
    %c0_23 = arith.constant 0 : index
    %73 = vector.load %arg6[%c0_22, %c0_23] : memref<1x1xf32, #tpu.memory_space<vmem>>, vector<1x1xf32>
    tpu.vector_store %arg6[%c0_22, %c0_23], %72 {strides = array<i32>} : memref<1x1xf32, #tpu.memory_space<vmem>>, vector<1x1xf32>,
    %c0_i32_24 = arith.constant 0 : i32
    %74 = arith.cmpi eq, %arg1, %c0_i32_24 : i32
    %75 = arith.extui %74 : i1 to i32
    %c0_i32_25 = arith.constant 0 : i32
    %76 = arith.cmpi ne, %75, %c0_i32_25 : i32
    scf.if %76 {
      %c0_26 = arith.constant 0 : index
      %c0_27 = arith.constant 0 : index
      %77 = vector.load %arg6[%c0_26, %c0_27] : memref<1x1xf32, #tpu.memory_space<vmem>>, vector<1x1xf32>
      %78 = vector.extract %77[0, 0] : f32 from vector<1x1xf32>
      %cst_28 = arith.constant 1.250000e-01 : f32
      %79 = arith.mulf %78, %cst_28 : f32
      %c0_29 = arith.constant 0 : index
      %c0_30 = arith.constant 0 : index
      %80 = memref.load %arg5[%c0_29, %c0_30] : memref<1x1xf32, #tpu.memory_space<smem>>
      memref.store %79, %arg5[%c0_29, %c0_30] : memref<1x1xf32, #tpu.memory_space<smem>>
    } else {
    }
    return
  }
  func.func @transform_0(%arg0: i32, %arg1: i32) -> (i32, i32) {
    %c1_i32 = arith.constant 1 : i32
    %0 = arith.muli %arg0, %c1_i32 : i32
    %1 = arith.addi %0, %arg1 : i32
    %c0_i32 = arith.constant 0 : i32
    %c0_i32_0 = arith.constant 0 : i32
    return %c0_i32, %1 : i32, i32
  }
  func.func @transform_1(%arg0: i32, %arg1: i32) -> (i32, i32) {
    %c1_i32 = arith.constant 1 : i32
    %0 = arith.muli %arg0, %c1_i32 : i32
    %1 = arith.addi %0, %arg1 : i32
    %c0_i32 = arith.constant 0 : i32
    %c0_i32_0 = arith.constant 0 : i32
    return %c0_i32, %1 : i32, i32
  }
  func.func @transform_2(%arg0: i32, %arg1: i32) -> (i32, i32) {
    %c0_i32 = arith.constant 0 : i32
    %c0_i32_0 = arith.constant 0 : i32
    %c0_i32_1 = arith.constant 0 : i32
    return %c0_i32, %c0_i32_0 : i32, i32
  }
  func.func @transform_3(%arg0: i32, %arg1: i32) -> (i32, i32) {
    %c0_i32 = arith.constant 0 : i32
    %c0_i32_0 = arith.constant 0 : i32
    return %arg0, %c0_i32 : i32, i32
  }
}

</mosaic_0001>

<bundles_post_ra>
// kernel: tpu_custom_call.1
= control target key start
LH: loop header
LB: loop body
LE: loop exit
PB: predicated region body
PF: predicated region fallthrough
CT: control target
= control target key end

     0   :  { %vm64_vm0 = vcmask 1044480   ;;  %vm50_vm1 = vcmask 0   ;;  %v214_v1 = vmov 0   ;;  %v215_v3 = vmov 0.0   ;;  %s259_s0 = inlined_call_operand.vmem [shape: f32[5,128], index: 0, kind: input, shape index: {}]   ;;  %s260_s1 = inlined_call_operand.vmem [shape: s32[1,128], index: 1, kind: input, shape index: {}]   ;;  %s261_s2 = inlined_call_operand.vmem [shape: f32[5,1], index: 2, kind: input, shape index: {}]   ;;  %s262_s3 = inlined_call_operand.hbm [shape: f32[1,1], index: 3, kind: output, shape index: {}]  }
   0x1   :  { %v54_v0 = vld [vmem:[%s261_s2] sm:$0x1f]  ;;  %197 = vset.pattern.permute.xlu0 %v214_v1  ;;  %51 = vst.msk [vmem:[#allocation2] sm:$0x1] %vm50_vm1, %v215_v3 }
   0x2   :  { %v52_v2 = vld [vmem:[%s259_s0] sm:$0x1f]  ;;  %95 = vperm.xlu0 %197, %v54_v0  }
   0x3   :  { %8 = vsyncpa [#allocation4], 0  ;;  %v65_v4 = vsel %vm64_vm0, %v52_v2, -inf  ;;  %v55_v15 = vlaneseq  ;;  %v187_v18 = vld [vmem:[%s260_s1] ss:$0 sm:$0xff]  ;;  %vm142_vm4 = vcmask 1040384  }
   0x4   :  { %v66_v5 = vrot.slane %v65_v4, 4  ;;  %s216_s18 = smov [#allocation3]  }
   0x5   :  { %v56_v17 = vshrl.u32 %v55_v15, 7  ;;  %v129_v0 = vand.u32 127, %v55_v15 }
   0x6   :  { %v67_v6 = vmax.f32 %v65_v4, %v66_v5 }
   0x7   :  { %vm61_vm2 = vcmp.eq.s32.totalorder %v56_v17, %v187_v18  ;;  %vm132_vm3 = vcmp.lt.s32.totalorder %v129_v0, 8 }
   0x8   :  { %v68_v7 = vrot.slane %v67_v6, 2  ;;  %v188_v21 = vsel %vm61_vm2, 1.0, %v215_v3  ;;  %v141_v18 = vld [vmem:[#allocation2] sm:$0x1] }
   0xa   :  { %v69_v8 = vmax.f32 %v67_v6, %v68_v7  ;;  %v189_v7 = vsel %vm132_vm3, 1.0, %v215_v3 }
   0xc   :  { %v70_v9 = vrot.slane %v69_v8, 1 }
   0xe   :  { %v71_v10 = vmax.f32 %v69_v8, %v70_v9 }
  0x10   :  { %v72_v11 = vsub.f32 %v52_v2, %v71_v10 }
  0x12   :  { %v73_v12 = vmul.f32 1.442695, %v72_v11  ;;  %v84_v23 = vmul.f32 %v188_v21, %v72_v11  ;;  %v114_v37 = vsel %vm64_vm0, %v72_v11, 0.0 }
  0x13   :  { %v115_v39 = vrot.slane %v114_v37, 4 }
  0x14   :  { %198 = vpow2.f32 %v73_v12  ;;  %v85_v25 = vsel %vm64_vm0, %v84_v23, 0.0 }
  0x15   :  { %v86_v27 = vrot.slane %v85_v25, 4  ;;  %v116_v40 = vadd.f32 %v115_v39, %v114_v37 }
  0x17   :  { %v87_v28 = vadd.f32 %v86_v27, %v85_v25  ;;  %v117_v41 = vrot.slane %v116_v40, 2 }
  0x19   :  { %v88_v29 = vrot.slane %v87_v28, 2  ;;  %v118_v42 = vadd.f32 %v117_v41, %v116_v40 }
  0x1b   :  { %v89_v30 = vadd.f32 %v88_v29, %v87_v28  ;;  %v119_v44 = vrot.slane %v118_v42, 1 }
  0x1d   :  { %v90_v31 = vrot.slane %v89_v30, 1  ;;  %v120_v50 = vadd.f32 %v119_v44, %v118_v42 }
  0x1f   :  { %v91_v34 = vadd.f32 %v90_v31, %v89_v30 }
  0x21   :  { %v199_v13 = vpop.eup %198 }
  0x22   :  { %v75_v14 = vsel %vm64_vm0, %v199_v13, 0.0 }
  0x23   :  { %v76_v16 = vrot.slane %v75_v14, 4 }
  0x25   :  { %v77_v19 = vadd.f32 %v76_v16, %v75_v14 }
  0x27   :  { %v78_v20 = vrot.slane %v77_v19, 2 }
  0x29   :  { %v79_v22 = vadd.f32 %v78_v20, %v77_v19 }
  0x2b   :  { %v80_v24 = vrot.slane %v79_v22, 1 }
  0x2d   :  { %v81_v26 = vadd.f32 %v80_v24, %v79_v22 }
  0x2f   :  { %200 = vlog2.f32 %v81_v26 }
  0x3c   :  { %v201_v32 = vpop.eup %200 }
  0x3d   :  { %v83_v33 = vmul.f32 0.6931472, %v201_v32 }
  0x3f   :  { %v92_v35 = vsub.f32 %v83_v33, %v91_v34  ;;  %v121_v51 = vmul.f32 5.0, %v83_v33 }
  0x41   :  { %v106_v36 = vsub.f32 0.0, %v92_v35  ;;  %v122_v55 = vsub.f32 %v120_v50, %v121_v51  ;;  %v124_v60 = vmul.f32 0.875, %v92_v35  ;;  %v135_v2 = vmul.f32 0.4, %v92_v35 }
  0x43   :  { %v107_v38 = vmul.f32 1.442695, %v106_v36  ;;  %v123_v59 = vmul.f32 -0.025, %v122_v55 }
  0x45   :  { %202 = vpow2.f32 %v107_v38  ;;  %v125_v63 = vadd.f32 %v124_v60, %v123_v59 }
  0x47   :  { %v138_v5 = vmul.f32 0.2, %v125_v63 }
  0x52   :  { %v203_v45 = vpop.eup %202 }
  0x53   :  { %v109_v49 = vsub.f32 1.0, %v203_v45 }
  0x55   :  { %v110_v54 = vmax.f32 %v109_v49, 0.0 }
  0x57   :  { %v111_v58 = vmul.f32 %v110_v54, %v110_v54 }
  0x7d   :  { %v96_v43 = vpop.permute.xlu0 %95 }
  0x7e   :  { %v98_v46 = vmul.f32 %v188_v21, %v96_v43 }
  0x80   :  { %v99_v47 = vsel %vm64_vm0, %v98_v46, 0.0 }
  0x81   :  { %v100_v48 = vrot.slane %v99_v47, 4 }
  0x83   :  { %v101_v52 = vadd.f32 %v100_v48, %v99_v47 }
  0x85   :  { %v102_v53 = vrot.slane %v101_v52, 2 }
  0x87   :  { %v103_v56 = vadd.f32 %v102_v53, %v101_v52 }
  0x89   :  { %v104_v57 = vrot.slane %v103_v56, 1 }
  0x8b   :  { %v105_v61 = vadd.f32 %v104_v57, %v103_v56 }
  0x8d   :  { %v112_v62 = vmul.f32 %v111_v58, %v105_v61 }
  0x8f   :  { %v113_v1 = vmul.f32 %v112_v62, %v92_v35 }
  0x91   :  { %v136_v4 = vmul.f32 0.4, %v113_v1 }
  0x93   :  { %v137_v6 = vadd.f32 %v136_v4, %v135_v2 }
  0x95   :  { %v139_v8 = vadd.f32 %v138_v5, %v137_v6 }
  0x97   :  { %v140_v9 = vmul.f32 %v189_v7, %v139_v8 }
  0x99   :  { %v143_v10 = vsel %vm142_vm4, %v140_v9, 0.0 }
  0x9a   :  { %144 = vadd.xlane.f32.xlu0 %v143_v10 }
 0x123   :  { %v145_v11 = vpop.xlane.xlu0 %144 }
 0x124   :  { %v146_v12 = vrot.slane %v145_v11, 4 }
 0x126   :  { %v147_v13 = vadd.f32 %v146_v12, %v145_v11 }
 0x128   :  { %v148_v14 = vrot.slane %v147_v13, 2 }
 0x12a   :  { %v149_v16 = vadd.f32 %v148_v14, %v147_v13 }
 0x12c   :  { %v150_v17 = vrot.slane %v149_v16, 1 }
 0x12e   :  { %v151_v15 = vadd.f32 %v150_v17, %v149_v16 }
 0x130   :  { %190 = vpush %v151_v15 }
 0x161   :  { %s191_s1 = spop %190 }
 0x162   :  { %v153_v19 = vstv %s191_s1 }
 0x163   :  { %v154_v20 = vadd.f32 %v153_v19, %v141_v18 }
 0x165   :  { %156 = vst.msk [vmem:[#allocation2] sm:$0x1] %vm50_vm1, %v154_v20 }
 0x16c   :  { %v160_v3 = vld [vmem:[#allocation2] sm:$0x1] }
 0x16d   :  { %192 = vpush %v160_v3 }
 0x19e   :  { %s193_s16 = spop %192 }
 0x19f   :  { %s162_s17 = smul.f32 0.125, %s193_s16 }
 0x1a1   :  { %164 = sst [smem:[#allocation3]] %s162_s17 }
 0x1a2   :  { %172 = dma.smem_to_hbm %s216_s18, 16, %s262_s3, [#allocation4]  }
 0x1a3   :  { %212 = dma.done.wait [#allocation4], 16  }
 0x1a4   :  { %213 = vsyncadd [#allocation4], 4294967280 }
 0x1a5   :  { %176 = sfence }
 0x1a6   :  { %177 = vsyncpa [#allocation4], 1 }

</bundles_post_ra>
